<compile_context>
chip_gen: v7x
topology: tpu7x:2x2x1
jax: 0.10.0
libtpu: 0.0.40
codegen_flags: <defaults>
</compile_context>

<pallas_src>
import functools

import jax
import jax.numpy as jnp
from jax.experimental import pallas as pl
from jax.experimental.pallas import tpu as pltpu


def _round_up(x: int, m: int) -> int:
    return ((x + m - 1) // m) * m


def classifier_block_kernel(x_ref, w1_ref, b1_ref, w2t_ref, b2_ref, o_ref):
    # x_ref  : (TILE_B, D_in)  VMEM (streamed)   w1_ref : (D_in, H) VMEM (resident)
    # b1_ref : (1, H)          VMEM (resident)   w2t_ref: (1, H)    VMEM (W2^T, resident)
    # b2_ref : (1, 1)          SMEM scalar
    # o_ref  : (1, 1, TILE_B)  VMEM (lane-dense scores for this batch tile)
    x = x_ref[...]

    # Layer 1: MXU matmul with f32 accumulation, bias + ReLU on the VPU.
    h = jnp.dot(x, w1_ref[...], preferred_element_type=jnp.float32) + b1_ref[...]
    h = jnp.maximum(h, 0.0)

    # Layer 2: 1-wide output -> VPU multiply + lane (XLU) reduction instead of a
    # skinny MXU matmul; b2 comes in as an SMEM scalar.
    s = jnp.sum(h * w2t_ref[...], axis=-1, keepdims=True)          # (TILE_B, 1)
    s = s + b2_ref[0, 0]

    # Lane-dense store: scores laid along the lane axis of the output block.
    o_ref[...] = jnp.transpose(s)[None, :, :].astype(o_ref.dtype)   # (1, 1, TILE_B)


def _vmem_capacity_bytes():
    """Best-effort physical VMEM query; None if unavailable."""
    try:
        info = pltpu.get_tpu_info()
        cap = getattr(info, "vmem_capacity_bytes", None)
        if cap:
            return int(cap)
    except Exception:
        pass
    return None


@functools.partial(jax.jit, static_argnames=("tile_b", "stream_bf16"))
def classifier_block_forward(x, w1, b1, w2, b2, *, tile_b=None, stream_bf16=False):
    B, D_in = x.shape
    H = w1.shape[1]
    assert w1.shape == (D_in, H)
    assert w2.shape == (H, 1)

    dsize = 4
    in_dtype = jnp.bfloat16 if stream_bf16 else jnp.float32
    in_size = 2 if stream_bf16 else 4

    # ---- generation-dependent VMEM cap -----------------------------------
    cap = _vmem_capacity_bytes()
    if cap is None:                         # unknown generation: be v7x-safe
        vmem_cap, dual_tc = 48 << 20, True
    elif cap <= (64 << 20):                 # v7x-class: 64 MiB / TC, 2 TCs
        vmem_cap, dual_tc = min(48 << 20, cap - (8 << 20)), True
    else:                                   # v5e / v6e: 128 MiB physical
        vmem_cap, dual_tc = min(100 << 20, cap - (16 << 20)), False
    vmem_cap = max(vmem_cap, 16 << 20)

    # ---- (8,128)-tiling-aware buffer sizes --------------------------------
    d_in_lanes = _round_up(D_in, 128)       # x buffer lane width
    h_lanes = _round_up(H, 128)             # hidden / weight lane width
    d_in_sub = _round_up(D_in, 8)
    # Constant-index blocks (W1, b1, W2^T) are still double-buffered by the
    # pipeline even though they are fetched once -> count them twice.
    weight_bytes = 2 * (d_in_sub * h_lanes + 8 * h_lanes + 8 * h_lanes) * dsize
    headroom = 4 << 20                      # compiler scratch

    # ---- derive tile_b from the VMEM budget --------------------------------
    if tile_b is None:
        budget = max(vmem_cap - weight_bytes - headroom, 1 << 20)
        per_row = (2 * d_in_lanes * in_size     # double-buffered x tile
                   + 2 * h_lanes * dsize        # layer-1 activations / temps
                   + 2 * 8 * dsize)             # double-buffered out tile (8 sublanes)
        tb = budget // per_row
    else:
        tb = int(tile_b)

    if B <= 128:
        tb = _round_up(B, 8)                    # single small tile
    else:
        tb = max(128, min(tb, 32768))
        if dual_tc and B > 256:
            # keep >= 2 grid tiles so ("parallel",) can shard the batch
            # across both TensorCores on dual-TC parts.
            tb = min(tb, _round_up(pl.cdiv(B, 2), 128))
        tb = min(tb, _round_up(B, 128))
        tb = (tb // 128) * 128
    n_tiles = pl.cdiv(B, tb)                    # last block may be ragged

    x_p = x.astype(in_dtype)
    w1_p = w1.astype(in_dtype)
    b1v = b1.reshape(1, H).astype(jnp.float32)
    w2t = jnp.transpose(w2.astype(jnp.float32))             # (1, H)
    b2s = b2.reshape(1, 1).astype(jnp.float32)               # SMEM scalar

    vmem_bytes = (2 * tb * d_in_lanes * in_size               # x double buffer
                  + 2 * tb * h_lanes * dsize                  # activation temps
                  + 2 * 8 * _round_up(tb, 128) * dsize        # out double buffer
                  + weight_bytes + headroom)
    vmem_limit = int(min(max(vmem_bytes, 16 << 20), vmem_cap))

    out = pl.pallas_call(
        classifier_block_kernel,
        out_shape=jax.ShapeDtypeStruct((n_tiles, 1, tb), jnp.float32),
        grid=(n_tiles,),
        in_specs=[
            pl.BlockSpec((tb, D_in), lambda i: (i, 0)),          # streamed x
            pl.BlockSpec((D_in, H), lambda i: (0, 0)),           # W1 resident
            pl.BlockSpec((1, H), lambda i: (0, 0)),              # b1 resident
            pl.BlockSpec((1, H), lambda i: (0, 0)),              # W2^T resident
            pl.BlockSpec(memory_space=pltpu.MemorySpace.SMEM),   # b2 scalar
        ],
        out_specs=pl.BlockSpec((1, 1, tb), lambda i: (i, 0, 0)),
        compiler_params=pltpu.CompilerParams(
            dimension_semantics=("parallel",),
            vmem_limit_bytes=vmem_limit,
        ),
    )(x_p, w1_p, b1v, w2t, b2s)

    # (n_tiles, 1, tb) lane-dense scores -> (B, 1); any ragged-tile garbage
    # rows fall beyond index B and are discarded here.
    return out.reshape(-1)[:B].reshape(B, 1)


if __name__ == "__main__":
    key = jax.random.PRNGKey(0)
    k_x, k_w1, k_b1, k_w2, k_b2 = jax.random.split(key, 5)

    # Flat feature vectors -> scalar decision score; B deliberately NOT a
    # multiple of 128 to exercise the ragged (un-padded) last batch block.
    B, D_in, H = 1000, 32, 32

    x  = jax.random.normal(k_x,  (B, D_in), dtype=jnp.float32)
    w1 = jax.random.normal(k_w1, (D_in, H), dtype=jnp.float32) * (1.0 / jnp.sqrt(D_in))
    b1 = jax.random.normal(k_b1, (1, H),    dtype=jnp.float32) * 0.01
    w2 = jax.random.normal(k_w2, (H, 1),    dtype=jnp.float32) * (1.0 / jnp.sqrt(H))
    b2 = jax.random.normal(k_b2, (1, 1),    dtype=jnp.float32) * 0.01

    out = classifier_block_forward(x, w1, b1, w2, b2)
    jax.block_until_ready(out)

    # correctness check against plain-JAX reference
    ref = jnp.maximum(x @ w1 + b1, 0.0) @ w2 + b2
    assert out.shape == (B, 1)
    assert jnp.allclose(out, ref, atol=1e-4, rtol=1e-4)

    print("KERNEL_OK")
</pallas_src>

<mosaic_0001>
module attributes {stable_mosaic.version = 11 : i64} {
  func.func @classifier_block_kernel(%arg0: i32, %arg1: memref<512x32xf32, #tpu.memory_space<vmem>>, %arg2: memref<32x32xf32, #tpu.memory_space<vmem>>, %arg3: memref<1x32xf32, #tpu.memory_space<vmem>>, %arg4: memref<1x32xf32, #tpu.memory_space<vmem>>, %arg5: memref<1x1xf32, #tpu.memory_space<smem>>, %arg6: memref<1x1x512xf32, #tpu.memory_space<vmem>>) attributes {dimension_semantics = [#tpu.dimension_semantics<parallel>], iteration_bounds = array<i64: 2>, scalar_prefetch = 0 : i64, scratch_operands = 0 : i64, tpu.core_type = #tpu.core_type<tc>, window_params = [{transform_indices = @transform_0, window_bounds = array<i64: 512, 32>}, {pipeline_mode = #tpu.pipeline_mode<synchronous>, transform_indices = @transform_1, window_bounds = array<i64: 32, 32>}, {pipeline_mode = #tpu.pipeline_mode<synchronous>, transform_indices = @transform_2, window_bounds = array<i64: 1, 32>}, {pipeline_mode = #tpu.pipeline_mode<synchronous>, transform_indices = @transform_3, window_bounds = array<i64: 1, 32>}, {transform_indices = @transform_4, window_bounds = array<i64: 1, 1>}, {transform_indices = @transform_5, window_bounds = array<i64: 1, 1, 512>}]} {
    %c0 = arith.constant 0 : index
    %c0_0 = arith.constant 0 : index
    %0 = vector.load %arg1[%c0, %c0_0] : memref<512x32xf32, #tpu.memory_space<vmem>>, vector<512x32xf32>
    %c0_1 = arith.constant 0 : index
    %c0_2 = arith.constant 0 : index
    %1 = vector.load %arg2[%c0_1, %c0_2] : memref<32x32xf32, #tpu.memory_space<vmem>>, vector<32x32xf32>
    %cst = arith.constant dense<0.000000e+00> : vector<512x32xf32>
    %2 = tpu.matmul %0, %1, %cst {dimension_numbers = #tpu.dot_dimension_numbers<[1], [0], [0], [1], [0, 0, 1, 1], [], []>} : vector<512x32xf32>, vector<32x32xf32>, vector<512x32xf32> -> vector<512x32xf32>
    %c0_3 = arith.constant 0 : index
    %c0_4 = arith.constant 0 : index
    %3 = vector.load %arg3[%c0_3, %c0_4] : memref<1x32xf32, #tpu.memory_space<vmem>>, vector<1x32xf32>
    %4 = vector.broadcast %3 : vector<1x32xf32> to vector<512x32xf32>
    %5 = arith.addf %2, %4 : vector<512x32xf32>
    %cst_5 = arith.constant 0.000000e+00 : f32
    %6 = vector.broadcast %cst_5 : f32 to vector<512x32xf32>
    %7 = arith.maximumf %5, %6 : vector<512x32xf32>
    %c0_6 = arith.constant 0 : index
    %c0_7 = arith.constant 0 : index
    %8 = vector.load %arg4[%c0_6, %c0_7] : memref<1x32xf32, #tpu.memory_space<vmem>>, vector<1x32xf32>
    %9 = vector.broadcast %8 : vector<1x32xf32> to vector<512x32xf32>
    %10 = arith.mulf %7, %9 : vector<512x32xf32>
    %cst_8 = arith.constant dense<0.000000e+00> : vector<512xf32>
    %11 = vector.multi_reduction <add>, %10, %cst_8 [1] : vector<512x32xf32> to vector<512xf32>
    %12 = vector.shape_cast %11 : vector<512xf32> to vector<512x1xf32>
    %c0_9 = arith.constant 0 : index
    %c0_10 = arith.constant 0 : index
    %13 = memref.load %arg5[%c0_9, %c0_10] : memref<1x1xf32, #tpu.memory_space<smem>>
    %14 = vector.broadcast %13 : f32 to vector<512x1xf32>
    %15 = arith.addf %12, %14 : vector<512x1xf32>
    %16 = tpu.transpose %15, [1, 0] : vector<512x1xf32> -> vector<1x512xf32>
    %17 = vector.shape_cast %16 : vector<1x512xf32> to vector<1x1x512xf32>
    %c0_11 = arith.constant 0 : index
    %c0_12 = arith.constant 0 : index
    %c0_13 = arith.constant 0 : index
    %18 = vector.load %arg6[%c0_11, %c0_12, %c0_13] : memref<1x1x512xf32, #tpu.memory_space<vmem>>, vector<1x1x512xf32>
    tpu.vector_store %arg6[%c0_11, %c0_12, %c0_13], %17 {strides = array<i32>} : memref<1x1x512xf32, #tpu.memory_space<vmem>>, vector<1x1x512xf32>,
    return
  }
  func.func @transform_0(%arg0: i32) -> (i32, i32) {
    %c0_i32 = arith.constant 0 : i32
    %c0_i32_0 = arith.constant 0 : i32
    return %arg0, %c0_i32 : i32, i32
  }
  func.func @transform_1(%arg0: i32) -> (i32, i32) {
    %c0_i32 = arith.constant 0 : i32
    %c0_i32_0 = arith.constant 0 : i32
    %c0_i32_1 = arith.constant 0 : i32
    return %c0_i32, %c0_i32_0 : i32, i32
  }
  func.func @transform_2(%arg0: i32) -> (i32, i32) {
    %c0_i32 = arith.constant 0 : i32
    %c0_i32_0 = arith.constant 0 : i32
    %c0_i32_1 = arith.constant 0 : i32
    return %c0_i32, %c0_i32_0 : i32, i32
  }
  func.func @transform_3(%arg0: i32) -> (i32, i32) {
    %c0_i32 = arith.constant 0 : i32
    %c0_i32_0 = arith.constant 0 : i32
    %c0_i32_1 = arith.constant 0 : i32
    return %c0_i32, %c0_i32_0 : i32, i32
  }
  func.func @transform_4(%arg0: i32) -> (i32, i32) {
    %c0_i32 = arith.constant 0 : i32
    %c0_i32_0 = arith.constant 0 : i32
    %c0_i32_1 = arith.constant 0 : i32
    return %c0_i32, %c0_i32_0 : i32, i32
  }
  func.func @transform_5(%arg0: i32) -> (i32, i32, i32) {
    %c0_i32 = arith.constant 0 : i32
    %c0_i32_0 = arith.constant 0 : i32
    %c0_i32_1 = arith.constant 0 : i32
    return %arg0, %c0_i32, %c0_i32_0 : i32, i32, i32
  }
}

</mosaic_0001>

<bundles_post_ra>
// kernel: classifier_block_forward.1
= control target key start
LH: loop header
LB: loop body
LE: loop exit
PB: predicated region body
PF: predicated region fallthrough
CT: control target
= control target key end

     0   :  { %s2658_s0 = inlined_call_operand.vmem [shape: f32[1000,32], index: 0, kind: input, shape index: {}]   ;;  %s2659_s1 = inlined_call_operand.vmem [shape: f32[32,32], index: 1, kind: input, shape index: {}]   ;;  %s2660_s2 = inlined_call_operand.vmem [shape: f32[1,32], index: 2, kind: input, shape index: {}]   ;;  %s2661_s3 = inlined_call_operand.vmem [shape: f32[1,32], index: 3, kind: input, shape index: {}]   ;;  %s2662_s4 = inlined_call_operand.<no memory space> [shape: f32[1,1], index: 4, kind: input, shape index: {}]   ;;  %s2663_s5 = inlined_call_operand.hbm [shape: f32[2,1,512], index: 5, kind: output, shape index: {}]  }
   0x1   :  { %10 = sst [smem:[#allocation2]] %s2662_s4 }
   0x2   :  { %11 = vsyncpa [#allocation4], 0 }
   0x3   :  { %13 = vsyncpa [#allocation4 + $0x1], 0  ;;  %s1930_s20 = smov 0   ;;  %s1932_s21 = smov 0  }
   0x4   :  { %s1934_s22 = smov 0   ;;  %s1936_s23 = smov 0  }
   0x5 LB: > { %s1527_s4 = sadd.s32 4294967295, %s1893_s23   ;;  %s1528_s24 = sadd.s32 4294967294, %s1893_s23   ;;  %s1893_s23 = sphi %s1936_s23, %s2669_s23   ;;  %s1889_s22 = sphi %s1934_s22, %s2668_s22   ;;  %s1885_s21 = sphi %s1932_s21, %s2667_s21   ;;  %s1881_s20 = sphi %s1930_s20, %s2666_s20  }
   0x6   : > { %s1953_s25 = sadd.s32 1, %s1893_s23   ;;  %s136_s26 = sadd.s32 1, %s1889_s22 }
   0x7   : > { %s133_s27 = ssub.s32 %s1893_s23, %s1953_s25  ;;  %p146_p0 = scmp.ne.s32.totalorder %s1889_s22, %s1885_s21 }
   0x8   : > { %p134_p1 = scmp.eq.s32.totalorder %s133_s27, 0  ;;  %p147_p2 = scmp.eq.s32.totalorder %s1527_s4, 1 }
   0x9   : > { %p152_p3 = scmp.ne.s32.totalorder %s1885_s21, %s1881_s20  ;;  %p153_p4 = scmp.eq.s32.totalorder %s1528_s24, 1 }
   0xa   : > { %s1963_s28 = scalar_select %p134_p1, %s1889_s22, %s136_s26  }
   0xb   : > { %p1965_p5 = por %p147_p2, %p146_p0  ;;  %p1969_p6 = por %p153_p4, %p152_p3 }
   0xc   : > { %p1531_p7 = scmp.ge.s32.totalorder %s1893_s23, 1  ;;  %p200_p8 = scmp.lt.s32.totalorder %s1893_s23, 3 }
   0xe   : > { %p201_p9 = pnand %p1531_p7, %p200_p8 }
   0xf   : > { %v310_v0 = vld [vmem:[%s2659_s1] sm:$0xff] (!%p201_p9)  ;;  %v311_v1 = vld [vmem:[%s2659_s1 + $0x8] sm:$0xff] (!%p201_p9)  ;;  %v312_v2 = vld [vmem:[%s2659_s1 + $0x10] sm:$0xff] (!%p201_p9)  ;;  %s1984_s12 = sshll.u32 (!%p201_p9), %s1527_s4, 6  ;;  %vm321_vm0 = vcmask (!%p201_p9), 261120   ;;  %s1226_s6 = sld [smem:[#allocation2]] (!%p201_p9) }
  0x10   : > { %204 = sbr.rel (%p201_p9) target bundleno = 671 (0x29f), region = 40  ;;  %v1779_v3 = vpack.c.bf16 (!%p201_p9), %v311_v1, %v310_v0  ;;  %v313_v4 = vld [vmem:[%s2659_s1 + $0x18] sm:$0xff] (!%p201_p9)  ;;  %p237_p10 = scmp.lt.s32.totalorder (!%p201_p9), %s1984_s12, 124 }
  0x11   : > { %v1783_v5 = vpack.c.bf16 (!%p201_p9), %v313_v4, %v312_v2  ;;  %s229_s7 = sand.u32 (!%p201_p9), 1, %s1885_s21   ;;  %s2616_s14 = scalar_lea.hbm (!%p201_p9), %s2663_s5, %s1984_s12 }
  0x12   : > { %1780 = vmatprep.subr.bf16.mxu0 (!%p201_p9), %v1779_v3  ;;  %1787 = vmatprep.subr.bf16.mxu1 (!%p201_p9), %v1779_v3  ;;  %s1532_s8 = sshll.u32 (!%p201_p9), %s229_s7, 2  ;;  %s1896_s17 = smov (!%p201_p9), [#allocation3]  }
  0x13   : > { %1782 = vmatpush3.bf16.msra.mxu0 (!%p201_p9), %v1779_v3  ;;  %1789 = vmatpush3.bf16.msra.mxu1 (!%p201_p9), %v1779_v3  ;;  %s231_s9 = scalar_lea.vmem (!%p201_p9), [#allocation3], %s1532_s8  ;;  %s1835_s18 = sshll.u32 (!%p201_p9), %s1896_s17, 4  ;;  %s1836_s18 = int_to_ptr.vmem [resolvable:$false] %s1835_s18 }
  0x14   : > { %1784 = vmatprep.subr.bf16.mxu0 (!%p201_p9), %v1783_v5  ;;  %1788 = vmatprep.subr.bf16.mxu1 (!%p201_p9), %v1783_v5  ;;  %s1469_s10 = sshll.u32 (!%p201_p9), %s231_s9, 4  ;;  %s2618_s10 = int_to_ptr.vmem [resolvable:$true] %s1469_s10 }
  0x15   : > { %p1838_p0 = scmp.lt.s32.totalorder (!%p201_p9), %s2618_s10, %s1836_s18 }
  0x17   : > { %s238_s15 = scalar_select %p237_p10, %s1984_s12, 124  ;;  %1786 = vmatpush3.bf16.msra.mxu0 %v1783_v5  ;;  %1790 = vmatpush3.bf16.msra.mxu1 %v1783_v5 }
  0x19   : > { %s1534_s16 = sshll.u32 %s238_s15, 3  ;;  %s1455_s15 = scalar_lea.sflag [#allocation4], %s229_s7 }
  0x1a   : > { %s1994_s19 = scalar_lea.vmem %s2658_s0, %s1534_s16  ;;  %s1831_s16 = scalar_lea.vmem %s2618_s10, 64 }
  0x1b   : > { %v246_v6 = vld [vmem:[%s1994_s19] sm:$0xff]  ;;  %v247_v8 = vld [vmem:[%s1994_s19 + $0x8] sm:$0xff]  ;;  %v248_v10 = vld [vmem:[%s1994_s19 + $0x10] sm:$0xff]  ;;  %p1832_p11 = scmp.ne.s32.totalorder %s2618_s10, %s1831_s16 }
  0x1c   : > { %v278_v7 = vld [vmem:[%s1994_s19 + $0x100] sm:$0xff]  ;;  %v279_v9 = vld [vmem:[%s1994_s19 + $0x108] sm:$0xff]  ;;  %1683 = vmatprep.mubr.msk.f32.mxu0 %vm321_vm0, %v246_v6  ;;  %v280_v11 = vld [vmem:[%s1994_s19 + $0x110] sm:$0xff] }
  0x1d   : > { %1731 = vmatprep.mubr.msk.f32.mxu1 %vm321_vm0, %v278_v7  ;;  %1684 = vmatmul.mubr.msk.f32.vlgmr.msra.gmra.mrb[0].mxu0 %vm321_vm0, %v247_v8  ;;  %v249_v12 = vld [vmem:[%s1994_s19 + $0x18] sm:$0xff]  ;;  %v250_v14 = vld [vmem:[%s1994_s19 + $0x20] sm:$0xff]  ;;  %v251_v16 = vld [vmem:[%s1994_s19 + $0x28] sm:$0xff]  ;;  %p1833_p12 = pnand %p1832_p11, %p1965_p5 }
  0x1e   : > { %1732 = vmatmul.mubr.msk.f32.vlgmr.msra.gmra.mrb[0].mxu1 %vm321_vm0, %v279_v9  ;;  %1686 = vmatprep.mubr.msk.f32.mxu0 %vm321_vm0, %v248_v10  ;;  %v281_v13 = vld [vmem:[%s1994_s19 + $0x118] sm:$0xff]  ;;  %v282_v15 = vld [vmem:[%s1994_s19 + $0x120] sm:$0xff]  ;;  %v283_v17 = vld [vmem:[%s1994_s19 + $0x128] sm:$0xff] }
  0x1f   : > { %1734 = vmatprep.mubr.msk.f32.mxu1 %vm321_vm0, %v280_v11  ;;  %v252_v18 = vld [vmem:[%s1994_s19 + $0x30] sm:$0xff]  ;;  %v253_v20 = vld [vmem:[%s1994_s19 + $0x38] sm:$0xff]  ;;  %v254_v22 = vld [vmem:[%s1994_s19 + $0x40] sm:$0xff]  ;;  %p1834_p13 = pneg %p1833_p12 }
  0x20   : > { %v284_v19 = vld [vmem:[%s1994_s19 + $0x130] sm:$0xff]  ;;  %v285_v21 = vld [vmem:[%s1994_s19 + $0x138] sm:$0xff]  ;;  %v286_v23 = vld [vmem:[%s1994_s19 + $0x140] sm:$0xff] }
  0x21   : > { %1687 = vmatmul.mubr.msk.f32.gmra.mrb[2].mxu0 %vm321_vm0, %v249_v12  ;;  %v255_v24 = vld [vmem:[%s1994_s19 + $0x48] sm:$0xff]  ;;  %v256_v26 = vld [vmem:[%s1994_s19 + $0x50] sm:$0xff]  ;;  %v257_v28 = vld [vmem:[%s1994_s19 + $0x58] sm:$0xff] }
  0x22   : > { %1735 = vmatmul.mubr.msk.f32.gmra.mrb[2].mxu1 %vm321_vm0, %v281_v13  ;;  %1689 = vmatprep.mubr.msk.f32.mxu0 %vm321_vm0, %v250_v14  ;;  %v287_v25 = vld [vmem:[%s1994_s19 + $0x148] sm:$0xff]  ;;  %v288_v27 = vld [vmem:[%s1994_s19 + $0x150] sm:$0xff]  ;;  %v289_v29 = vld [vmem:[%s1994_s19 + $0x158] sm:$0xff] }
  0x23   : > { %1737 = vmatprep.mubr.msk.f32.mxu1 %vm321_vm0, %v282_v15  ;;  %v258_v30 = vld [vmem:[%s1994_s19 + $0x60] sm:$0xff]  ;;  %v259_v32 = vld [vmem:[%s1994_s19 + $0x68] sm:$0xff]  ;;  %v260_v34 = vld [vmem:[%s1994_s19 + $0x70] sm:$0xff] }
  0x24   : > { %v290_v31 = vld [vmem:[%s1994_s19 + $0x160] sm:$0xff]  ;;  %v291_v33 = vld [vmem:[%s1994_s19 + $0x168] sm:$0xff]  ;;  %v292_v35 = vld [vmem:[%s1994_s19 + $0x170] sm:$0xff] }
  0x25   : > { %1690 = vmatmul.mubr.msk.f32.gmra.mrb[4].mxu0 %vm321_vm0, %v251_v16  ;;  %v261_v36 = vld [vmem:[%s1994_s19 + $0x78] sm:$0xff]  ;;  %v262_v38 = vld [vmem:[%s1994_s19 + $0x80] sm:$0xff]  ;;  %v263_v40 = vld [vmem:[%s1994_s19 + $0x88] sm:$0xff] }
  0x26   : > { %1738 = vmatmul.mubr.msk.f32.gmra.mrb[4].mxu1 %vm321_vm0, %v283_v17  ;;  %1692 = vmatprep.mubr.msk.f32.mxu0 %vm321_vm0, %v252_v18  ;;  %v293_v37 = vld [vmem:[%s1994_s19 + $0x178] sm:$0xff]  ;;  %v294_v39 = vld [vmem:[%s1994_s19 + $0x180] sm:$0xff]  ;;  %v295_v41 = vld [vmem:[%s1994_s19 + $0x188] sm:$0xff] }
  0x27   : > { %1740 = vmatprep.mubr.msk.f32.mxu1 %vm321_vm0, %v284_v19  ;;  %v264_v42 = vld [vmem:[%s1994_s19 + $0x90] sm:$0xff]  ;;  %v265_v44 = vld [vmem:[%s1994_s19 + $0x98] sm:$0xff]  ;;  %v266_v46 = vld [vmem:[%s1994_s19 + $0xa0] sm:$0xff] }
  0x28   : > { %v296_v43 = vld [vmem:[%s1994_s19 + $0x190] sm:$0xff]  ;;  %v297_v45 = vld [vmem:[%s1994_s19 + $0x198] sm:$0xff]  ;;  %v298_v47 = vld [vmem:[%s1994_s19 + $0x1a0] sm:$0xff] }
  0x29   : > { %1693 = vmatmul.mubr.msk.f32.gmra.mrb[6].mxu0 %vm321_vm0, %v253_v20  ;;  %v267_v48 = vld [vmem:[%s1994_s19 + $0xa8] sm:$0xff]  ;;  %v268_v50 = vld [vmem:[%s1994_s19 + $0xb0] sm:$0xff]  ;;  %v269_v52 = vld [vmem:[%s1994_s19 + $0xb8] sm:$0xff] }
  0x2a   : > { %1741 = vmatmul.mubr.msk.f32.gmra.mrb[6].mxu1 %vm321_vm0, %v285_v21  ;;  %1695 = vmatprep.mubr.msk.f32.mxu0 %vm321_vm0, %v254_v22  ;;  %v299_v49 = vld [vmem:[%s1994_s19 + $0x1a8] sm:$0xff]  ;;  %v300_v51 = vld [vmem:[%s1994_s19 + $0x1b0] sm:$0xff]  ;;  %v301_v53 = vld [vmem:[%s1994_s19 + $0x1b8] sm:$0xff] }
  0x2b   : > { %1743 = vmatprep.mubr.msk.f32.mxu1 %vm321_vm0, %v286_v23  ;;  %v270_v54 = vld [vmem:[%s1994_s19 + $0xc0] sm:$0xff]  ;;  %v271_v56 = vld [vmem:[%s1994_s19 + $0xc8] sm:$0xff]  ;;  %v272_v58 = vld [vmem:[%s1994_s19 + $0xd0] sm:$0xff] }
  0x2c   : > { %v302_v55 = vld [vmem:[%s1994_s19 + $0x1c0] sm:$0xff]  ;;  %v303_v57 = vld [vmem:[%s1994_s19 + $0x1c8] sm:$0xff]  ;;  %v304_v59 = vld [vmem:[%s1994_s19 + $0x1d0] sm:$0xff] }
  0x2d   : > { %1696 = vmatmul.mubr.msk.f32.gmra.mrb[8].mxu0 %vm321_vm0, %v255_v24  ;;  %v273_v60 = vld [vmem:[%s1994_s19 + $0xd8] sm:$0xff]  ;;  %v274_v62 = vld [vmem:[%s1994_s19 + $0xe0] sm:$0xff]  ;;  %v275_v0 = vld [vmem:[%s1994_s19 + $0xe8] sm:$0xff] }
  0x2e   : > { %1744 = vmatmul.mubr.msk.f32.gmra.mrb[8].mxu1 %vm321_vm0, %v287_v25  ;;  %1698 = vmatprep.mubr.msk.f32.mxu0 %vm321_vm0, %v256_v26  ;;  %v305_v61 = vld [vmem:[%s1994_s19 + $0x1d8] sm:$0xff]  ;;  %v306_v63 = vld [vmem:[%s1994_s19 + $0x1e0] sm:$0xff]  ;;  %v307_v1 = vld [vmem:[%s1994_s19 + $0x1e8] sm:$0xff] }
  0x2f   : > { %1746 = vmatprep.mubr.msk.f32.mxu1 %vm321_vm0, %v288_v27  ;;  %v276_v2 = vld [vmem:[%s1994_s19 + $0xf0] sm:$0xff]  ;;  %v277_v4 = vld [vmem:[%s1994_s19 + $0xf8] sm:$0xff]  ;;  %v2127_v6 = vld [vmem:[%s2660_s2] ss:$0 sm:$0xff] }
  0x30   : > { %v308_v3 = vld [vmem:[%s1994_s19 + $0x1f0] sm:$0xff]  ;;  %v309_v5 = vld [vmem:[%s1994_s19 + $0x1f8] sm:$0xff]  ;;  %v2136_v15 = vld [vmem:[%s2661_s3] ss:$0 sm:$0xff]  ;;  %s1837_s19 = scalar_lea.vmem %s1836_s18, 128 }
  0x31   : > { %1699 = vmatmul.mubr.msk.f32.gmra.mrb[10].mxu0 %vm321_vm0, %v257_v28  ;;  %p1839_p1 = scmp.lt.s32.totalorder %s1837_s19, %s1831_s16 }
  0x32   : > { %1747 = vmatmul.mubr.msk.f32.gmra.mrb[10].mxu1 %vm321_vm0, %v289_v29  ;;  %1701 = vmatprep.mubr.msk.f32.mxu0 %vm321_vm0, %v258_v30 }
  0x33   : > { %1749 = vmatprep.mubr.msk.f32.mxu1 %vm321_vm0, %v290_v31  ;;  %p1840_p2 = por %p1839_p1, %p1838_p0 }
  0x35   : > { %1702 = vmatmul.mubr.msk.f32.gmra.mrb[12].mxu0 %vm321_vm0, %v259_v32  ;;  %p1841_p3 = pnand %p1840_p2, %p1834_p13 }
  0x36   : > { %1750 = vmatmul.mubr.msk.f32.gmra.mrb[12].mxu1 %vm321_vm0, %v291_v33  ;;  %1704 = vmatprep.mubr.msk.f32.mxu0 %vm321_vm0, %v260_v34 }
  0x37   : > { %1752 = vmatprep.mubr.msk.f32.mxu1 %vm321_vm0, %v292_v35 }
  0x39   : > { %1705 = vmatmul.mubr.msk.f32.gmra.mrb[14].mxu0 %vm321_vm0, %v261_v36 }
  0x3a   : > { %1753 = vmatmul.mubr.msk.f32.gmra.mrb[14].mxu1 %vm321_vm0, %v293_v37  ;;  %1707 = vmatprep.mubr.msk.f32.mxu0 %vm321_vm0, %v262_v38 }
  0x3b   : > { %1755 = vmatprep.mubr.msk.f32.mxu1 %vm321_vm0, %v294_v39 }
  0x3d   : > { %1708 = vmatmul.mubr.msk.f32.gmra.mrb[16].mxu0 %vm321_vm0, %v263_v40 }
  0x3e   : > { %1756 = vmatmul.mubr.msk.f32.gmra.mrb[16].mxu1 %vm321_vm0, %v295_v41  ;;  %1710 = vmatprep.mubr.msk.f32.mxu0 %vm321_vm0, %v264_v42 }
  0x3f   : > { %1758 = vmatprep.mubr.msk.f32.mxu1 %vm321_vm0, %v296_v43 }
  0x41   : > { %1711 = vmatmul.mubr.msk.f32.gmra.mrb[18].mxu0 %vm321_vm0, %v265_v44 }
  0x42   : > { %1759 = vmatmul.mubr.msk.f32.gmra.mrb[18].mxu1 %vm321_vm0, %v297_v45  ;;  %1713 = vmatprep.mubr.msk.f32.mxu0 %vm321_vm0, %v266_v46 }
  0x43   : > { %1761 = vmatprep.mubr.msk.f32.mxu1 %vm321_vm0, %v298_v47 }
  0x45   : > { %1714 = vmatmul.mubr.msk.f32.gmra.mrb[20].mxu0 %vm321_vm0, %v267_v48 }
  0x46   : > { %1762 = vmatmul.mubr.msk.f32.gmra.mrb[20].mxu1 %vm321_vm0, %v299_v49  ;;  %1716 = vmatprep.mubr.msk.f32.mxu0 %vm321_vm0, %v268_v50 }
  0x47   : > { %1764 = vmatprep.mubr.msk.f32.mxu1 %vm321_vm0, %v300_v51 }
  0x49   : > { %1717 = vmatmul.mubr.msk.f32.gmra.mrb[22].mxu0 %vm321_vm0, %v269_v52 }
  0x4a   : > { %1765 = vmatmul.mubr.msk.f32.gmra.mrb[22].mxu1 %vm321_vm0, %v301_v53  ;;  %1719 = vmatprep.mubr.msk.f32.mxu0 %vm321_vm0, %v270_v54 }
  0x4b   : > { %1767 = vmatprep.mubr.msk.f32.mxu1 %vm321_vm0, %v302_v55 }
  0x4d   : > { %1720 = vmatmul.mubr.msk.f32.gmra.mrb[24].mxu0 %vm321_vm0, %v271_v56 }
  0x4e   : > { %1768 = vmatmul.mubr.msk.f32.gmra.mrb[24].mxu1 %vm321_vm0, %v303_v57  ;;  %1722 = vmatprep.mubr.msk.f32.mxu0 %vm321_vm0, %v272_v58 }
  0x4f   : > { %1770 = vmatprep.mubr.msk.f32.mxu1 %vm321_vm0, %v304_v59 }
  0x51   : > { %1723 = vmatmul.mubr.msk.f32.gmra.mrb[26].mxu0 %vm321_vm0, %v273_v60 }
  0x52   : > { %1771 = vmatmul.mubr.msk.f32.gmra.mrb[26].mxu1 %vm321_vm0, %v305_v61  ;;  %1725 = vmatprep.mubr.msk.f32.mxu0 %vm321_vm0, %v274_v62 }
  0x53   : > { %1773 = vmatprep.mubr.msk.f32.mxu1 %vm321_vm0, %v306_v63 }
  0x55   : > { %1726 = vmatmul.mubr.msk.f32.gmra.mrb[28].mxu0 %vm321_vm0, %v275_v0 }
  0x56   : > { %1774 = vmatmul.mubr.msk.f32.gmra.mrb[28].mxu1 %vm321_vm0, %v307_v1  ;;  %1728 = vmatprep.mubr.msk.f32.mxu0 %vm321_vm0, %v276_v2 }
  0x57   : > { %1776 = vmatprep.mubr.msk.f32.mxu1 %vm321_vm0, %v308_v3 }
  0x59   : > { %1729 = vmatmul.mubr.msk.f32.gmra.mrb[30].mxu0 %vm321_vm0, %v277_v4 }
  0x5a   : > { %1777 = vmatmul.mubr.msk.f32.gmra.mrb[30].mxu1 %vm321_vm0, %v309_v5 }
  0xf0   : > { %v1685_v7 = vpop.f32.mrb[0].mxu0 }
  0xf1   : > { %v1733_v8 = vpop.f32.mrb[0].mxu1  ;;  %v586_v9 = vadd.f32 %v1685_v7, %v2127_v6  ;;  %v580_v11 = vpop.f32.mrb[1].mxu0 }
  0xf2   : > { %v746_v10 = vadd.f32 %v1733_v8, %v2127_v6  ;;  %v740_v12 = vpop.f32.mrb[1].mxu1  ;;  %v581_v13 = vadd.f32 %v2127_v6, %v580_v11 }
  0xf3   : > { %v741_v14 = vadd.f32 %v2127_v6, %v740_v12  ;;  %v900_v16 = vmax.f32 %v586_v9, 0.0 }
  0xf4   : > { %v932_v17 = vmax.f32 %v746_v10, 0.0  ;;  %v899_v18 = vmax.f32 %v581_v13, 0.0  ;;  %v1688_v19 = vpop.f32.mrb[2].mxu0 }
  0xf5   : > { %v1736_v20 = vpop.f32.mrb[2].mxu1  ;;  %v596_v21 = vadd.f32 %v1688_v19, %v2127_v6  ;;  %v971_v24 = vmul.f32 %v2136_v15, %v900_v16  ;;  %v590_v25 = vpop.f32.mrb[3].mxu0  ;;  %v931_v27 = vmax.f32 %v741_v14, 0.0 }
  0xf6   : > { %v1003_v22 = vmul.f32 %v2136_v15, %v932_v17  ;;  %v756_v23 = vadd.f32 %v1736_v20, %v2127_v6  ;;  %v750_v26 = vpop.f32.mrb[3].mxu1  ;;  %v591_v28 = vadd.f32 %v2127_v6, %v590_v25  ;;  %v970_v30 = vmul.f32 %v2136_v15, %v899_v18 }
  0xf7   : > { %v751_v29 = vadd.f32 %v2127_v6, %v750_v26  ;;  %v902_v31 = vmax.f32 %v596_v21, 0.0  ;;  %v1037_v34 = vsel %vm321_vm0, %v971_v24, 0.0  ;;  %v1002_v44 = vmul.f32 %v2136_v15, %v931_v27 }
  0xf8   : > { %v1133_v32 = vsel %vm321_vm0, %v1003_v22, 0.0  ;;  %v934_v33 = vmax.f32 %v756_v23, 0.0  ;;  %1038 = vadd.xlane.f32.xlu0 %v1037_v34  ;;  %v1691_v36 = vpop.f32.mrb[4].mxu0  ;;  %v901_v45 = vmax.f32 %v591_v28, 0.0  ;;  %v1034_v47 = vsel %vm321_vm0, %v970_v30, 0.0 }
  0xf9   : > { %1134 = vadd.xlane.f32.xlu1 %v1133_v32  ;;  %v933_v35 = vmax.f32 %v751_v29, 0.0  ;;  %v1739_v37 = vpop.f32.mrb[4].mxu1  ;;  %v973_v38 = vmul.f32 %v2136_v15, %v902_v31  ;;  %v606_v39 = vadd.f32 %v1691_v36, %v2127_v6  ;;  %v600_v40 = vpop.f32.mrb[5].mxu0  ;;  %v1130_v58 = vsel %vm321_vm0, %v1002_v44, 0.0 }
  0xfa   : > { %v1005_v41 = vmul.f32 %v2136_v15, %v934_v33  ;;  %v760_v42 = vpop.f32.mrb[5].mxu1  ;;  %v601_v43 = vadd.f32 %v2127_v6, %v600_v40  ;;  %v766_v48 = vadd.f32 %v1739_v37, %v2127_v6  ;;  %v972_v60 = vmul.f32 %v2136_v15, %v901_v45 }
  0xfb   : > { %v1043_v46 = vsel %vm321_vm0, %v973_v38, 0.0  ;;  %v761_v49 = vadd.f32 %v2127_v6, %v760_v42  ;;  %v1004_v50 = vmul.f32 %v2136_v15, %v933_v35  ;;  %v904_v53 = vmax.f32 %v606_v39, 0.0 }
  0xfc   : > { %1035 = vadd.xlane.f32.xlu0 %v1034_v47  ;;  %v1694_v51 = vpop.f32.mrb[6].mxu0  ;;  %v903_v54 = vmax.f32 %v601_v43, 0.0  ;;  %v1139_v55 = vsel %vm321_vm0, %v1005_v41, 0.0  ;;  %v936_v59 = vmax.f32 %v766_v48, 0.0  ;;  %v1040_v10 = vsel %vm321_vm0, %v972_v60, 0.0 }
  0xfd   : > { %1044 = vadd.xlane.f32.xlu1 %v1043_v46  ;;  %v1742_v52 = vpop.f32.mrb[6].mxu1  ;;  %v610_v56 = vpop.f32.mrb[7].mxu0  ;;  %v935_v61 = vmax.f32 %v761_v49, 0.0  ;;  %v1136_v62 = vsel %vm321_vm0, %v1004_v50, 0.0  ;;  %v616_v1 = vadd.f32 %v1694_v51, %v2127_v6  ;;  %v975_v3 = vmul.f32 %v2136_v15, %v904_v53 }
  0xfe   : > { %v770_v57 = vpop.f32.mrb[7].mxu1  ;;  %v611_v2 = vadd.f32 %v2127_v6, %v610_v56  ;;  %v974_v4 = vmul.f32 %v2136_v15, %v903_v54  ;;  %v776_v8 = vadd.f32 %v1742_v52, %v2127_v6  ;;  %v1007_v11 = vmul.f32 %v2136_v15, %v936_v59 }
  0xff   : > { %v771_v9 = vadd.f32 %v2127_v6, %v770_v57  ;;  %v1006_v14 = vmul.f32 %v2136_v15, %v935_v61  ;;  %v906_v20 = vmax.f32 %v616_v1, 0.0  ;;  %v1049_v22 = vsel %vm321_vm0, %v975_v3, 0.0 }
 0x100   : > { %1131 = vadd.xlane.f32.xlu0 %v1130_v58  ;;  %v1697_v63 = vpop.f32.mrb[8].mxu0  ;;  %v905_v21 = vmax.f32 %v611_v2, 0.0  ;;  %v1046_v23 = vsel %vm321_vm0, %v974_v4, 0.0  ;;  %v938_v26 = vmax.f32 %v776_v8, 0.0  ;;  %v1145_v32 = vsel %vm321_vm0, %v1007_v11, 0.0 }
 0x101   : > { %1140 = vadd.xlane.f32.xlu1 %v1139_v55  ;;  %v1745_v0 = vpop.f32.mrb[8].mxu1  ;;  %v620_v5 = vpop.f32.mrb[9].mxu0  ;;  %v626_v12 = vadd.f32 %v1697_v63, %v2127_v6  ;;  %v937_v27 = vmax.f32 %v771_v9, 0.0  ;;  %v1142_v38 = vsel %vm321_vm0, %v1006_v14, 0.0  ;;  %v977_v39 = vmul.f32 %v2136_v15, %v906_v20 }
 0x102   : > { %v780_v7 = vpop.f32.mrb[9].mxu1  ;;  %v786_v13 = vadd.f32 %v1745_v0, %v2127_v6  ;;  %v621_v16 = vadd.f32 %v2127_v6, %v620_v5  ;;  %v976_v40 = vmul.f32 %v2136_v15, %v905_v21  ;;  %v1009_v44 = vmul.f32 %v2136_v15, %v938_v26 }
 0x103   : > { %v781_v17 = vadd.f32 %v2127_v6, %v780_v7  ;;  %v908_v29 = vmax.f32 %v626_v12, 0.0  ;;  %v1008_v45 = vmul.f32 %v2136_v15, %v937_v27  ;;  %v1055_v55 = vsel %vm321_vm0, %v977_v39, 0.0 }
 0x104   : > { %1137 = vadd.xlane.f32.xlu0 %v1136_v62  ;;  %v1700_v18 = vpop.f32.mrb[10].mxu0  ;;  %v940_v30 = vmax.f32 %v786_v13, 0.0  ;;  %v907_v33 = vmax.f32 %v621_v16, 0.0  ;;  %v1052_v56 = vsel %vm321_vm0, %v976_v40, 0.0  ;;  %v1151_v60 = vsel %vm321_vm0, %v1009_v44, 0.0 }
 0x105   : > { %1041 = vadd.xlane.f32.xlu1 %v1040_v10  ;;  %v1748_v19 = vpop.f32.mrb[10].mxu1  ;;  %v630_v24 = vpop.f32.mrb[11].mxu0  ;;  %v636_v28 = vadd.f32 %v1700_v18, %v2127_v6  ;;  %v939_v34 = vmax.f32 %v781_v17, 0.0  ;;  %v979_v47 = vmul.f32 %v2136_v15, %v908_v29  ;;  %v1148_v61 = vsel %vm321_vm0, %v1008_v45, 0.0 }
 0x106   : > { %v790_v25 = vpop.f32.mrb[11].mxu1  ;;  %v796_v31 = vadd.f32 %v1748_v19, %v2127_v6  ;;  %v631_v35 = vadd.f32 %v2127_v6, %v630_v24  ;;  %v1011_v49 = vmul.f32 %v2136_v15, %v940_v30  ;;  %v978_v51 = vmul.f32 %v2136_v15, %v907_v33 }
 0x107   : > { %v791_v41 = vadd.f32 %v2127_v6, %v790_v25  ;;  %v910_v46 = vmax.f32 %v636_v28, 0.0  ;;  %v1010_v52 = vmul.f32 %v2136_v15, %v939_v34  ;;  %v1061_v0 = vsel %vm321_vm0, %v979_v47, 0.0 }
 0x108   : > { %1047 = vadd.xlane.f32.xlu0 %v1046_v23  ;;  %v1703_v36 = vpop.f32.mrb[12].mxu0  ;;  %v942_v48 = vmax.f32 %v796_v31, 0.0  ;;  %v909_v50 = vmax.f32 %v631_v35, 0.0  ;;  %v2204_v1 = vsel %vm321_vm0, %v1011_v49, 0.0  ;;  %v1058_v4 = vsel %vm321_vm0, %v978_v51, 0.0 }
 0x109   : > { %1050 = vadd.xlane.f32.xlu1 %v1049_v22  ;;  %v1751_v37 = vpop.f32.mrb[12].mxu1  ;;  %v640_v42 = vpop.f32.mrb[13].mxu0  ;;  %v941_v57 = vmax.f32 %v791_v41, 0.0  ;;  %v646_v62 = vadd.f32 %v1703_v36, %v2127_v6  ;;  %v981_v63 = vmul.f32 %v2136_v15, %v910_v46  ;;  %v2212_v5 = vsel %vm321_vm0, %v1010_v52, 0.0 }
 0x10a   : > { %v800_v43 = vpop.f32.mrb[13].mxu1  ;;  %v2207_v2 = vadd.f32 %v1751_v37, %v2127_v6  ;;  %v1013_v3 = vmul.f32 %v2136_v15, %v942_v48  ;;  %v2215_v7 = vadd.f32 %v2127_v6, %v640_v42  ;;  %v980_v8 = vmul.f32 %v2136_v15, %v909_v50 }
 0x10b   : > { %v2219_v11 = vadd.f32 %v2127_v6, %v800_v43  ;;  %v1012_v12 = vmul.f32 %v2136_v15, %v941_v57  ;;  %v912_v18 = vmax.f32 %v646_v62, 0.0  ;;  %v2225_v19 = vsel %vm321_vm0, %v981_v63, 0.0 }
 0x10c   : > { %1143 = vadd.xlane.f32.xlu0 %v1142_v38  ;;  %v1706_v53 = vpop.f32.mrb[14].mxu0  ;;  %v944_v22 = vmax.f32 %v2207_v2, 0.0  ;;  %v2231_v23 = vsel %vm321_vm0, %v1013_v3, 0.0  ;;  %v911_v26 = vmax.f32 %v2215_v7, 0.0  ;;  %v2235_v27 = vsel %vm321_vm0, %v980_v8, 0.0 }
 0x10d   : > { %1146 = vadd.xlane.f32.xlu1 %v1145_v32  ;;  %v2190_v54 = vpop.f32.mrb[14].mxu1  ;;  %v2194_v58 = vpop.f32.mrb[15].mxu0  ;;  %v943_v42 = vmax.f32 %v2219_v11, 0.0  ;;  %v2255_v43 = vsel %vm321_vm0, %v1012_v12, 0.0  ;;  %v2258_v46 = vadd.f32 %v1706_v53, %v2127_v6  ;;  %v983_v47 = vmul.f32 %v2136_v15, %v912_v18 }
 0x10e   : > { %v2196_v59 = vpop.f32.mrb[15].mxu1  ;;  %v2279_v2 = vadd.f32 %v2190_v54, %v2127_v6  ;;  %v1015_v3 = vmul.f32 %v2136_v15, %v944_v22  ;;  %v2286_v8 = vadd.f32 %v2127_v6, %v2194_v58 }
 0x10f   : > { %v2307_v22 = vadd.f32 %v2127_v6, %v2196_v59 }
 0x110   : > { %1053 = vadd.xlane.f32.xlu0 %v1052_v56  ;;  %v1709_v9 = vpop.f32.mrb[16].mxu0 }
 0x111   : > { %1056 = vadd.xlane.f32.xlu1 %v1055_v55  ;;  %v1757_v10 = vpop.f32.mrb[16].mxu1  ;;  %v666_v13 = vadd.f32 %v1709_v9, %v2127_v6  ;;  %v660_v14 = vpop.f32.mrb[17].mxu0  ;;  %v982_v9 = vmul.f32 %v2136_v15, %v911_v26 }
 0x112   : > { %v826_v16 = vadd.f32 %v1757_v10, %v2127_v6  ;;  %v820_v17 = vpop.f32.mrb[17].mxu1  ;;  %v661_v20 = vadd.f32 %v2127_v6, %v660_v14 }
 0x113   : > { %v821_v21 = vadd.f32 %v2127_v6, %v820_v17  ;;  %v916_v24 = vmax.f32 %v666_v13, 0.0 }
 0x114   : > { %v948_v25 = vmax.f32 %v826_v16, 0.0  ;;  %1149 = vadd.xlane.f32.xlu0 %v1148_v61  ;;  %v915_v28 = vmax.f32 %v661_v20, 0.0  ;;  %v1712_v30 = vpop.f32.mrb[18].mxu0 }
 0x115   : > { %1152 = vadd.xlane.f32.xlu1 %v1151_v60  ;;  %v947_v29 = vmax.f32 %v821_v21, 0.0  ;;  %v1760_v31 = vpop.f32.mrb[18].mxu1  ;;  %v676_v32 = vadd.f32 %v1712_v30, %v2127_v6  ;;  %v670_v33 = vpop.f32.mrb[19].mxu0  ;;  %v2239_v34 = vmul.f32 %v2136_v15, %v916_v24  ;;  %v1014_v24 = vmul.f32 %v2136_v15, %v943_v42 }
 0x116   : > { %v836_v35 = vadd.f32 %v1760_v31, %v2127_v6  ;;  %v830_v36 = vpop.f32.mrb[19].mxu1  ;;  %v2243_v37 = vmul.f32 %v2136_v15, %v948_v25  ;;  %v671_v38 = vadd.f32 %v2127_v6, %v670_v33  ;;  %v2247_v39 = vmul.f32 %v2136_v15, %v915_v28 }
 0x117   : > { %v831_v40 = vadd.f32 %v2127_v6, %v830_v36  ;;  %v2251_v41 = vmul.f32 %v2136_v15, %v947_v29  ;;  %v918_v44 = vmax.f32 %v676_v32, 0.0  ;;  %v914_v28 = vmax.f32 %v2258_v46, 0.0 }
 0x118   : > { %v950_v45 = vmax.f32 %v836_v35, 0.0  ;;  %1059 = vadd.xlane.f32.xlu0 %v1058_v4  ;;  %v917_v48 = vmax.f32 %v671_v38, 0.0  ;;  %v1715_v50 = vpop.f32.mrb[20].mxu0  ;;  %v1073_v29 = vsel %vm321_vm0, %v983_v47, 0.0  ;;  %v946_v46 = vmax.f32 %v2279_v2, 0.0 }
 0x119   : > { %1062 = vadd.xlane.f32.xlu1 %v1061_v0  ;;  %v949_v49 = vmax.f32 %v831_v40, 0.0  ;;  %v1763_v51 = vpop.f32.mrb[20].mxu1  ;;  %v686_v52 = vadd.f32 %v1715_v50, %v2127_v6  ;;  %v680_v55 = vpop.f32.mrb[21].mxu0  ;;  %v2263_v56 = vmul.f32 %v2136_v15, %v918_v44  ;;  %v1169_v47 = vsel %vm321_vm0, %v1015_v3, 0.0 }
 0x11a   : > { %v846_v57 = vadd.f32 %v1763_v51, %v2127_v6  ;;  %v840_v60 = vpop.f32.mrb[21].mxu1  ;;  %v2267_v61 = vmul.f32 %v2136_v15, %v950_v45  ;;  %v681_v53 = vadd.f32 %v2127_v6, %v680_v55  ;;  %v2271_v62 = vmul.f32 %v2136_v15, %v917_v48 }
 0x11b   : > { %v841_v63 = vadd.f32 %v2127_v6, %v840_v60  ;;  %v2275_v0 = vmul.f32 %v2136_v15, %v949_v49  ;;  %v920_v4 = vmax.f32 %v686_v52, 0.0  ;;  %v913_v50 = vmax.f32 %v2286_v8, 0.0 }
 0x11c   : > { %v952_v7 = vmax.f32 %v846_v57, 0.0  ;;  %1155 = vadd.xlane.f32.xlu0 %v2212_v5  ;;  %v919_v10 = vmax.f32 %v681_v53, 0.0  ;;  %v1718_v12 = vpop.f32.mrb[22].mxu0  ;;  %v1070_v51 = vsel %vm321_vm0, %v982_v9, 0.0 }
 0x11d   : > { %1158 = vadd.xlane.f32.xlu1 %v2204_v1  ;;  %v951_v11 = vmax.f32 %v841_v63, 0.0  ;;  %v1766_v13 = vpop.f32.mrb[22].mxu1  ;;  %v696_v54 = vadd.f32 %v1718_v12, %v2127_v6  ;;  %v690_v14 = vpop.f32.mrb[23].mxu0  ;;  %v2291_v16 = vmul.f32 %v2136_v15, %v920_v4 }
 0x11e   : > { %v856_v1 = vadd.f32 %v1766_v13, %v2127_v6  ;;  %v850_v17 = vpop.f32.mrb[23].mxu1  ;;  %v2295_v5 = vmul.f32 %v2136_v15, %v952_v7  ;;  %v691_v58 = vadd.f32 %v2127_v6, %v690_v14  ;;  %v2299_v18 = vmul.f32 %v2136_v15, %v919_v10 }
 0x11f   : > { %v851_v20 = vadd.f32 %v2127_v6, %v850_v17  ;;  %v2303_v21 = vmul.f32 %v2136_v15, %v951_v11  ;;  %v922_v25 = vmax.f32 %v696_v54, 0.0  ;;  %v945_v10 = vmax.f32 %v2307_v22, 0.0 }
 0x120   : > { %v954_v26 = vmax.f32 %v856_v1, 0.0  ;;  %1065 = vadd.xlane.f32.xlu0 %v2235_v27  ;;  %v921_v30 = vmax.f32 %v691_v58, 0.0  ;;  %v1721_v32 = vpop.f32.mrb[24].mxu0  ;;  %v1166_v11 = vsel %vm321_vm0, %v1014_v24, 0.0  ;;  %v985_v54 = vmul.f32 %v2136_v15, %v914_v28 }
 0x121   : > { %1068 = vadd.xlane.f32.xlu1 %v2225_v19  ;;  %v953_v31 = vmax.f32 %v851_v20, 0.0  ;;  %v1769_v33 = vpop.f32.mrb[24].mxu1  ;;  %v706_v35 = vadd.f32 %v1721_v32, %v2127_v6  ;;  %v700_v59 = vpop.f32.mrb[25].mxu0  ;;  %v2316_v36 = vmul.f32 %v2136_v15, %v922_v25  ;;  %v984_v14 = vmul.f32 %v2136_v15, %v913_v50 }
 0x122   : > { %v866_v38 = vadd.f32 %v1769_v33, %v2127_v6  ;;  %v860_v40 = vpop.f32.mrb[25].mxu1  ;;  %v2320_v19 = vmul.f32 %v2136_v15, %v954_v26  ;;  %v701_v27 = vadd.f32 %v2127_v6, %v700_v59  ;;  %v2324_v42 = vmul.f32 %v2136_v15, %v921_v30 }
 0x123   : > { %v861_v44 = vadd.f32 %v2127_v6, %v860_v40  ;;  %v2328_v45 = vmul.f32 %v2136_v15, %v953_v31  ;;  %v924_v48 = vmax.f32 %v706_v35, 0.0  ;;  %v1017_v35 = vmul.f32 %v2136_v15, %v946_v46 }
 0x124   : > { %v956_v49 = vmax.f32 %v866_v38, 0.0  ;;  %1161 = vadd.xlane.f32.xlu0 %v2255_v43  ;;  %v923_v52 = vmax.f32 %v701_v27, 0.0  ;;  %v1724_v57 = vpop.f32.mrb[26].mxu0  ;;  %v1016_v59 = vmul.f32 %v2136_v15, %v945_v10  ;;  %v1079_v27 = vsel %vm321_vm0, %v985_v54, 0.0 }
 0x125   : > { %1164 = vadd.xlane.f32.xlu1 %v2231_v23  ;;  %v955_v55 = vmax.f32 %v861_v44, 0.0  ;;  %v1772_v60 = vpop.f32.mrb[26].mxu1  ;;  %v716_v53 = vadd.f32 %v1724_v57, %v2127_v6  ;;  %v710_v63 = vpop.f32.mrb[27].mxu0  ;;  %v2338_v2 = vmul.f32 %v2136_v15, %v924_v48  ;;  %v1076_v44 = vsel %vm321_vm0, %v984_v14, 0.0 }
 0x126   : > { %v876_v3 = vadd.f32 %v1772_v60, %v2127_v6  ;;  %v870_v4 = vpop.f32.mrb[27].mxu1  ;;  %v2342_v23 = vmul.f32 %v2136_v15, %v956_v49  ;;  %v711_v43 = vadd.f32 %v2127_v6, %v710_v63  ;;  %v2346_v7 = vmul.f32 %v2136_v15, %v923_v52 }
 0x127   : > { %v871_v8 = vadd.f32 %v2127_v6, %v870_v4  ;;  %v2350_v9 = vmul.f32 %v2136_v15, %v955_v55  ;;  %v926_v12 = vmax.f32 %v716_v53, 0.0 }
 0x128   : > { %v958_v13 = vmax.f32 %v876_v3, 0.0  ;;  %1071 = vadd.xlane.f32.xlu0 %v1070_v51  ;;  %v925_v1 = vmax.f32 %v711_v43, 0.0  ;;  %v1727_v58 = vpop.f32.mrb[28].mxu0 }
 0x129   : > { %1074 = vadd.xlane.f32.xlu1 %v1073_v29  ;;  %v957_v17 = vmax.f32 %v871_v8, 0.0  ;;  %v1775_v20 = vpop.f32.mrb[28].mxu1  ;;  %v726_v25 = vadd.f32 %v1727_v58, %v2127_v6  ;;  %v720_v26 = vpop.f32.mrb[29].mxu0  ;;  %v2358_v30 = vmul.f32 %v2136_v15, %v926_v12  ;;  %v1175_v12 = vsel %vm321_vm0, %v1017_v35, 0.0 }
 0x12a   : > { %v886_v22 = vadd.f32 %v1775_v20, %v2127_v6  ;;  %v880_v24 = vpop.f32.mrb[29].mxu1  ;;  %v2362_v29 = vmul.f32 %v2136_v15, %v958_v13  ;;  %v721_v28 = vadd.f32 %v2127_v6, %v720_v26  ;;  %v2366_v31 = vmul.f32 %v2136_v15, %v925_v1 }
 0x12b   : > { %v881_v32 = vadd.f32 %v2127_v6, %v880_v24  ;;  %v2370_v33 = vmul.f32 %v2136_v15, %v957_v17  ;;  %v928_v38 = vmax.f32 %v726_v25, 0.0  ;;  %v1172_v13 = vsel %vm321_vm0, %v1016_v59, 0.0 }
 0x12c   : > { %v960_v40 = vmax.f32 %v886_v22, 0.0  ;;  %1167 = vadd.xlane.f32.xlu0 %v1166_v11  ;;  %v927_v48 = vmax.f32 %v721_v28, 0.0  ;;  %v1730_v50 = vpop.f32.mrb[30].mxu0  ;;  %v1085_v17 = vsel %vm321_vm0, %v2239_v34, 0.0  ;;  %v1082_v58 = vsel %vm321_vm0, %v2247_v39, 0.0 }
 0x12d   : > { %1170 = vadd.xlane.f32.xlu1 %v1169_v47  ;;  %v959_v49 = vmax.f32 %v881_v32, 0.0  ;;  %v1778_v51 = vpop.f32.mrb[30].mxu1  ;;  %v736_v52 = vadd.f32 %v1730_v50, %v2127_v6  ;;  %v730_v55 = vpop.f32.mrb[31].mxu0  ;;  %v2378_v57 = vmul.f32 %v2136_v15, %v928_v38  ;;  %v1181_v20 = vsel %vm321_vm0, %v2243_v37, 0.0 }
 0x12e   : > { %v896_v46 = vadd.f32 %v1778_v51, %v2127_v6  ;;  %v890_v60 = vpop.f32.mrb[31].mxu1  ;;  %v2382_v47 = vmul.f32 %v2136_v15, %v960_v40  ;;  %v731_v53 = vadd.f32 %v2127_v6, %v730_v55  ;;  %v2386_v63 = vmul.f32 %v2136_v15, %v927_v48 }
 0x12f   : > { %v891_v3 = vadd.f32 %v2127_v6, %v890_v60  ;;  %v2390_v4 = vmul.f32 %v2136_v15, %v959_v49  ;;  %v930_v43 = vmax.f32 %v736_v52, 0.0  ;;  %v1178_v25 = vsel %vm321_vm0, %v2251_v41, 0.0 }
 0x130   : > { %v962_v8 = vmax.f32 %v896_v46, 0.0  ;;  %1077 = vadd.xlane.f32.xlu0 %v1076_v44  ;;  %v929_v10 = vmax.f32 %v731_v53, 0.0  ;;  %v1088_v26 = vsel %vm321_vm0, %v2271_v62, 0.0  ;;  %v1187_v34 = vsel %vm321_vm0, %v2267_v61, 0.0 }
 0x131   : > { %1080 = vadd.xlane.f32.xlu1 %v1079_v27  ;;  %v961_v11 = vmax.f32 %v891_v3, 0.0  ;;  %v1001_v54 = vmul.f32 %v2136_v15, %v930_v43  ;;  %v1184_v39 = vsel %vm321_vm0, %v2275_v0, 0.0  ;;  %v1097_v37 = vsel %vm321_vm0, %v2291_v16, 0.0 }
 0x132   : > { %v2396_v14 = vmul.f32 %v2136_v15, %v962_v8  ;;  %v1000_v6 = vmul.f32 %v2136_v15, %v929_v10  ;;  %v1094_v41 = vsel %vm321_vm0, %v2299_v18, 0.0  ;;  %v1190_v62 = vsel %vm321_vm0, %v2303_v21, 0.0 }
 0x133   : > { %v2400_v1 = vmul.f32 %v2136_v15, %v961_v11  ;;  %v1091_v15 = vsel %vm321_vm0, %v2263_v56, 0.0  ;;  %v1193_v56 = vsel %vm321_vm0, %v2295_v5, 0.0  ;;  %v1103_v61 = vsel %vm321_vm0, %v2316_v36, 0.0 }
 0x134   : > { %1173 = vadd.xlane.f32.xlu0 %v1172_v13  ;;  %v1100_v0 = vsel %vm321_vm0, %v2324_v42, 0.0  ;;  %v1199_v16 = vsel %vm321_vm0, %v2320_v19, 0.0  ;;  %v1196_v18 = vsel %vm321_vm0, %v2328_v45, 0.0  ;;  %v1109_v5 = vsel %vm321_vm0, %v2338_v2, 0.0 }
 0x135   : > { %1176 = vadd.xlane.f32.xlu1 %v1175_v12  ;;  %v1106_v21 = vsel %vm321_vm0, %v2346_v7, 0.0  ;;  %v1205_v36 = vsel %vm321_vm0, %v2342_v23, 0.0  ;;  %v1202_v42 = vsel %vm321_vm0, %v2350_v9, 0.0  ;;  %v1115_v19 = vsel %vm321_vm0, %v2358_v30, 0.0 }
 0x136   : > { %v1112_v45 = vsel %vm321_vm0, %v2366_v31, 0.0  ;;  %v1211_v2 = vsel %vm321_vm0, %v2362_v29, 0.0  ;;  %v1208_v7 = vsel %vm321_vm0, %v2370_v33, 0.0  ;;  %v1121_v23 = vsel %vm321_vm0, %v2378_v57, 0.0 }
 0x137   : > { %v1118_v9 = vsel %vm321_vm0, %v2386_v63, 0.0  ;;  %v1217_v30 = vsel %vm321_vm0, %v2382_v47, 0.0  ;;  %v1214_v22 = vsel %vm321_vm0, %v2390_v4, 0.0  ;;  %v1127_v24 = vsel %vm321_vm0, %v1001_v54, 0.0 }
 0x138   : > { %1083 = vadd.xlane.f32.xlu0 %v1082_v58  ;;  %v1124_v29 = vsel %vm321_vm0, %v1000_v6, 0.0  ;;  %v1220_v28 = vsel %vm321_vm0, %v2400_v1, 0.0  ;;  %v1223_v31 = vsel %vm321_vm0, %v2396_v14, 0.0  ;;  %v2476_v57 = vstv %s1226_s6 }
 0x139   : > { %1086 = vadd.xlane.f32.xlu1 %v1085_v17 }
 0x13c   : > { %1179 = vadd.xlane.f32.xlu0 %v1178_v25 }
 0x13d   : > { %1182 = vadd.xlane.f32.xlu1 %v1181_v20 }
 0x140   : > { %1089 = vadd.xlane.f32.xlu0 %v1088_v26 }
 0x141   : > { %1092 = vadd.xlane.f32.xlu1 %v1091_v15 }
 0x144   : > { %1185 = vadd.xlane.f32.xlu0 %v1184_v39 }
 0x145   : > { %1188 = vadd.xlane.f32.xlu1 %v1187_v34 }
 0x148   : > { %1095 = vadd.xlane.f32.xlu0 %v1094_v41 }
 0x149   : > { %1098 = vadd.xlane.f32.xlu1 %v1097_v37 }
 0x14c   : > { %1191 = vadd.xlane.f32.xlu0 %v1190_v62 }
 0x14d   : > { %1194 = vadd.xlane.f32.xlu1 %v1193_v56 }
 0x150   : > { %1101 = vadd.xlane.f32.xlu0 %v1100_v0 }
 0x151   : > { %1104 = vadd.xlane.f32.xlu1 %v1103_v61 }
 0x154   : > { %1197 = vadd.xlane.f32.xlu0 %v1196_v18 }
 0x155   : > { %1200 = vadd.xlane.f32.xlu1 %v1199_v16 }
 0x158   : > { %1107 = vadd.xlane.f32.xlu0 %v1106_v21 }
 0x159   : > { %1110 = vadd.xlane.f32.xlu1 %v1109_v5 }
 0x15c   : > { %1203 = vadd.xlane.f32.xlu0 %v1202_v42 }
 0x15d   : > { %1206 = vadd.xlane.f32.xlu1 %v1205_v36 }
 0x160   : > { %1113 = vadd.xlane.f32.xlu0 %v1112_v45 }
 0x161   : > { %1116 = vadd.xlane.f32.xlu1 %v1115_v19 }
 0x164   : > { %1209 = vadd.xlane.f32.xlu0 %v1208_v7 }
 0x165   : > { %1212 = vadd.xlane.f32.xlu1 %v1211_v2 }
 0x168   : > { %1119 = vadd.xlane.f32.xlu0 %v1118_v9 }
 0x169   : > { %1122 = vadd.xlane.f32.xlu1 %v1121_v23 }
 0x16c   : > { %1215 = vadd.xlane.f32.xlu0 %v1214_v22 }
 0x16d   : > { %1218 = vadd.xlane.f32.xlu1 %v1217_v30 }
 0x170   : > { %1125 = vadd.xlane.f32.xlu0 %v1124_v29 }
 0x171   : > { %1128 = vadd.xlane.f32.xlu1 %v1127_v24 }
 0x174   : > { %1221 = vadd.xlane.f32.xlu0 %v1220_v28 }
 0x175   : > { %1224 = vadd.xlane.f32.xlu1 %v1223_v31 }
 0x185   : > { %v1039_v33 = vpop.xlane.xlu0 %1038 }
 0x186   : > { %v2464_v32 = vpop.xlane.xlu1 %1134  ;;  %v1229_v53 = vadd.f32 %v2476_v57, %v1039_v33 }
 0x189   : > { %v1036_v59 = vpop.xlane.xlu0 %1035 }
 0x18a   : > { %v1045_v35 = vpop.xlane.xlu1 %1044  ;;  %v1228_v46 = vadd.f32 %v2476_v57, %v1036_v59 }
 0x18b   : > { %v1231_v10 = vadd.f32 %v2476_v57, %v1045_v35 }
 0x18d   : > { %v2468_v40 = vpop.xlane.xlu0 %1131 }
 0x18e   : > { %v2466_v38 = vpop.xlane.xlu1 %1140 }
 0x191   : > { %v2470_v44 = vpop.xlane.xlu0 %1137 }
 0x192   : > { %v1042_v27 = vpop.xlane.xlu1 %1041 }
 0x193   : > { %v1230_v4 = vadd.f32 %v2476_v57, %v1042_v27 }
 0x195   : > { %v1048_v49 = vpop.xlane.xlu0 %1047 }
 0x196   : > { %v1051_v48 = vpop.xlane.xlu1 %1050  ;;  %v1232_v13 = vadd.f32 %v2476_v57, %v1048_v49 }
 0x197   : > { %v1233_v6 = vadd.f32 %v2476_v57, %v1051_v48 }
 0x199   : > { %v2474_v51 = vpop.xlane.xlu0 %1143 }
 0x19a   : > { %v2472_v50 = vpop.xlane.xlu1 %1146 }
 0x19d   : > { %v1054_v55 = vpop.xlane.xlu0 %1053 }
 0x19e   : > { %v1057_v52 = vpop.xlane.xlu1 %1056  ;;  %v1234_v58 = vadd.f32 %v2476_v57, %v1054_v55 }
 0x19f   : > { %v1235_v15 = vadd.f32 %v2476_v57, %v1057_v52  ;;  %v1260_v52 = vadd.f32 %v2476_v57, %v2468_v40  ;;  %v1262_v40 = vadd.f32 %v2476_v57, %v2470_v44  ;;  %v1264_v44 = vadd.f32 %v2476_v57, %v2474_v51 }
 0x1a1   : > { %1292 = vxpose.xlu0.b32.start [1/16] (narrow) %v1228_v46, 8  ;;  %v2481_v47 = vpop.xlane.xlu0 %1149 }
 0x1a2   : > { %v2479_v60 = vpop.xlane.xlu1 %1152 }
 0x1a5   : > { %1293 = vxpose.xlu0.b32.cont [2/16] (narrow) %v1229_v53, 8  ;;  %v1060_v3 = vpop.xlane.xlu0 %1059 }
 0x1a6   : > { %v1063_v63 = vpop.xlane.xlu1 %1062  ;;  %v1236_v39 = vadd.f32 %v2476_v57, %v1060_v3 }
 0x1a7   : > { %v1237_v56 = vadd.f32 %v2476_v57, %v1063_v63  ;;  %v1261_v63 = vadd.f32 %v2476_v57, %v2464_v32  ;;  %v1263_v32 = vadd.f32 %v2476_v57, %v2466_v38 }
 0x1a9   : > { %1294 = vxpose.xlu0.b32.cont [3/16] (narrow) %v1230_v4, 8  ;;  %v2487_v8 = vpop.xlane.xlu0 %1155 }
 0x1aa   : > { %v2485_v43 = vpop.xlane.xlu1 %1158 }
 0x1ad   : > { %1295 = vxpose.xlu0.b32.cont [4/16] (narrow) %v1231_v10, 8  ;;  %v1066_v12 = vpop.xlane.xlu0 %1065 }
 0x1ae   : > { %v1069_v11 = vpop.xlane.xlu1 %1068  ;;  %v1238_v16 = vadd.f32 %v2476_v57, %v1066_v12 }
 0x1af   : > { %v1239_v36 = vadd.f32 %v2476_v57, %v1069_v11 }
 0x1b1   : > { %1296 = vxpose.xlu0.b32.cont [5/16] (narrow) %v1232_v13, 8  ;;  %v2493_v14 = vpop.xlane.xlu0 %1161 }
 0x1b2   : > { %v2491_v54 = vpop.xlane.xlu1 %1164 }
 0x1b5   : > { %1297 = vxpose.xlu0.b32.cont [6/16] (narrow) %v1233_v6, 8  ;;  %v1072_v17 = vpop.xlane.xlu0 %1071 }
 0x1b6   : > { %v1075_v1 = vpop.xlane.xlu1 %1074  ;;  %v1240_v2 = vadd.f32 %v2476_v57, %v1072_v17 }
 0x1b7   : > { %v1241_v30 = vadd.f32 %v2476_v57, %v1075_v1 }
 0x1b9   : > { %1298 = vxpose.xlu0.b32.cont [7/16] (narrow) %v1234_v58, 8  ;;  %v2499_v25 = vpop.xlane.xlu0 %1167 }
 0x1ba   : > { %v2497_v20 = vpop.xlane.xlu1 %1170 }
 0x1bd   : > { %1299 = vxpose.xlu0.b32.cont [8/16] (narrow) %v1235_v15, 8  ;;  %v1078_v34 = vpop.xlane.xlu0 %1077 }
 0x1be   : > { %v1081_v26 = vpop.xlane.xlu1 %1080  ;;  %v1242_v28 = vadd.f32 %v2476_v57, %v1078_v34  ;;  %v1265_v34 = vadd.f32 %v2476_v57, %v2472_v50 }
 0x1bf   : > { %v1243_v59 = vadd.f32 %v2476_v57, %v1081_v26 }
 0x1c1   : > { %1300 = vxpose.xlu0.b32.cont [9/16] (narrow) %v1236_v39, 8  ;;  %v2505_v41 = vpop.xlane.xlu0 %1173 }
 0x1c2   : > { %v2503_v37 = vpop.xlane.xlu1 %1176 }
 0x1c5   : > { %1301 = vxpose.xlu0.b32.cont [10/16] (narrow) %v1237_v56, 8  ;;  %v1084_v61 = vpop.xlane.xlu0 %1083 }
 0x1c6   : > { %v1087_v62 = vpop.xlane.xlu1 %1086  ;;  %v1244_v0 = vadd.f32 %v2476_v57, %v1084_v61 }
 0x1c7   : > { %v1245_v21 = vadd.f32 %v2476_v57, %v1087_v62  ;;  %v1266_v62 = vadd.f32 %v2476_v57, %v2481_v47 }
 0x1c8   : > { %1324 = vxpose.xlu1.b32.start [1/16] (narrow) %v1244_v0, 8 }
 0x1c9   : > { %1302 = vxpose.xlu0.b32.cont [11/16] (narrow) %v1238_v16, 8  ;;  %v2512_v5 = vpop.xlane.xlu0 %1179  ;;  %v1267_v16 = vadd.f32 %v2476_v57, %v2479_v60 }
 0x1ca   : > { %v2510_v18 = vpop.xlane.xlu1 %1182  ;;  %v1276_v60 = vadd.f32 %v2476_v57, %v2512_v5  ;;  %v1273_v5 = vadd.f32 %v2476_v57, %v2497_v20 }
 0x1cc   : > { %1325 = vxpose.xlu1.b32.cont [2/16] (narrow) %v1245_v21, 8 }
 0x1cd   : > { %1303 = vxpose.xlu0.b32.cont [12/16] (narrow) %v1239_v36, 8  ;;  %v1090_v19 = vpop.xlane.xlu0 %1089  ;;  %v1268_v36 = vadd.f32 %v2476_v57, %v2487_v8  ;;  %v1277_v8 = vadd.f32 %v2476_v57, %v2510_v18  ;;  %v1274_v18 = vadd.f32 %v2476_v57, %v2505_v41 }
 0x1ce   : > { %v1093_v42 = vpop.xlane.xlu1 %1092  ;;  %v1246_v45 = vadd.f32 %v2476_v57, %v1090_v19  ;;  %v1269_v19 = vadd.f32 %v2476_v57, %v2485_v43 }
 0x1cf   : > { %v1247_v9 = vadd.f32 %v2476_v57, %v1093_v42 }
 0x1d0   : > { %1326 = vxpose.xlu1.b32.cont [3/16] (narrow) %v1246_v45, 8  ;;  %v1270_v45 = vadd.f32 %v2476_v57, %v2493_v14 }
 0x1d1   : > { %1304 = vxpose.xlu0.b32.cont [13/16] (narrow) %v1240_v2, 8  ;;  %v2520_v23 = vpop.xlane.xlu0 %1185  ;;  %v1271_v2 = vadd.f32 %v2476_v57, %v2491_v54 }
 0x1d2   : > { %v2518_v7 = vpop.xlane.xlu1 %1188  ;;  %v1278_v43 = vadd.f32 %v2476_v57, %v2520_v23  ;;  %v1275_v23 = vadd.f32 %v2476_v57, %v2503_v37 }
 0x1d3   : > { %v1279_v14 = vadd.f32 %v2476_v57, %v2518_v7 }
 0x1d4   : > { %1327 = vxpose.xlu1.b32.cont [4/16] (narrow) %v1247_v9, 8  ;;  %v1272_v9 = vadd.f32 %v2476_v57, %v2499_v25 }
 0x1d5   : > { %1305 = vxpose.xlu0.b32.cont [14/16] (narrow) %v1241_v30, 8  ;;  %v1096_v24 = vpop.xlane.xlu0 %1095 }
 0x1d6   : > { %v1099_v22 = vpop.xlane.xlu1 %1098  ;;  %v1248_v29 = vadd.f32 %v2476_v57, %v1096_v24 }
 0x1d7   : > { %v1249_v35 = vadd.f32 %v2476_v57, %v1099_v22 }
 0x1d8   : > { %1328 = vxpose.xlu1.b32.cont [5/16] (narrow) %v1248_v29, 8 }
 0x1d9   : > { %1306 = vxpose.xlu0.b32.cont [15/16] (narrow) %v1242_v28, 8  ;;  %v2528_v33 = vpop.xlane.xlu0 %1191 }
 0x1da   : > { %v2526_v31 = vpop.xlane.xlu1 %1194  ;;  %v1280_v54 = vadd.f32 %v2476_v57, %v2528_v33 }
 0x1db   : > { %v1281_v25 = vadd.f32 %v2476_v57, %v2526_v31 }
 0x1dc   : > { %1329 = vxpose.xlu1.b32.cont [6/16] (narrow) %v1249_v35, 8 }
 0x1dd   : > { %1307 = vxpose.xlu0.b32.end [16/16] (narrow) %v1243_v59, 8  ;;  %v1102_v48 = vpop.xlane.xlu0 %1101  ;;  %v1895_v59 = vmov 1966171168  }
 0x1de   : > { %v1105_v27 = vpop.xlane.xlu1 %1104  ;;  %v1250_v49 = vadd.f32 %v2476_v57, %v1102_v48  ;;  %v1429_v48 = vlaneseq }
 0x1df   : > { %v1251_v53 = vadd.f32 %v2476_v57, %v1105_v27  ;;  %v1427_v27 = vunpack.c.l.s4 %v1895_v59 }
 0x1e0   : > { %1330 = vxpose.xlu1.b32.cont [7/16] (narrow) %v1250_v49, 8  ;;  %vm1451_vm1 = vcmp.lt.s32.totalorder %v1429_v48, 512 }
 0x1e1   : > { %1356 = vxpose.xlu0.b32.start [1/16] (narrow) %v1260_v52, 8  ;;  %v2537_v46 = vpop.xlane.xlu0 %1197 }
 0x1e2   : > { %v2535_v55 = vpop.xlane.xlu1 %1200  ;;  %v1282_v20 = vadd.f32 %v2476_v57, %v2537_v46  ;;  %v1430_v46 = vshrl.u32 %v1429_v48, 7 }
 0x1e3   : > { %v1283_v7 = vadd.f32 %v2476_v57, %v2535_v55  ;;  %v1428_v55 = vunpack.c.0.s8 %v1427_v27 }
 0x1e4   : > { %1331 = vxpose.xlu1.b32.cont [8/16] (narrow) %v1251_v53, 8 }
 0x1e5   : > { %1357 = vxpose.xlu0.b32.cont [2/16] (narrow) %v1261_v63, 8  ;;  %v1108_v4 = vpop.xlane.xlu0 %1107  ;;  %v1431_v63 = vsub.s32 %v1428_v55, %v1430_v46 }
 0x1e6   : > { %v1111_v3 = vpop.xlane.xlu1 %1110  ;;  %v1252_v10 = vadd.f32 %v2476_v57, %v1108_v4 }
 0x1e7   : > { %v1253_v13 = vadd.f32 %v2476_v57, %v1111_v3 }
 0x1e8   : > { %1332 = vxpose.xlu1.b32.cont [9/16] (narrow) %v1252_v10, 8 }
 0x1e9   : > { %1358 = vxpose.xlu0.b32.cont [3/16] (narrow) %v1262_v40, 8  ;;  %v2547_v12 = vpop.xlane.xlu0 %1203 }
 0x1ea   : > { %v2545_v11 = vpop.xlane.xlu1 %1206  ;;  %v1284_v41 = vadd.f32 %v2476_v57, %v2547_v12 }
 0x1eb   : > { %v1285_v30 = vadd.f32 %v2476_v57, %v2545_v11 }
 0x1ec   : > { %1333 = vxpose.xlu1.b32.cont [10/16] (narrow) %v1253_v13, 8 }
 0x1ed   : > { %1359 = vxpose.xlu0.b32.cont [4/16] (narrow) %v1263_v32, 8  ;;  %v1114_v1 = vpop.xlane.xlu0 %1113 }
 0x1ee   : > { %v1117_v6 = vpop.xlane.xlu1 %1116  ;;  %v1254_v17 = vadd.f32 %v2476_v57, %v1114_v1 }
 0x1ef   : > { %v1255_v26 = vadd.f32 %v2476_v57, %v1117_v6 }
 0x1f0   : > { %1334 = vxpose.xlu1.b32.cont [11/16] (narrow) %v1254_v17, 8 }
 0x1f1   : > { %1360 = vxpose.xlu0.b32.cont [5/16] (narrow) %v1264_v44, 8  ;;  %v1210_v15 = vpop.xlane.xlu0 %1209 }
 0x1f2   : > { %v2555_v58 = vpop.xlane.xlu1 %1212  ;;  %v1286_v37 = vadd.f32 %v2476_v57, %v1210_v15 }
 0x1f3   : > { %v1287_v22 = vadd.f32 %v2476_v57, %v2555_v58 }
 0x1f4   : > { %1335 = vxpose.xlu1.b32.cont [12/16] (narrow) %v1255_v26, 8 }
 0x1f5   : > { %1361 = vxpose.xlu0.b32.cont [6/16] (narrow) %v1265_v34, 8  ;;  %v1120_v39 = vpop.xlane.xlu0 %1119 }
 0x1f6   : > { %v1123_v38 = vpop.xlane.xlu1 %1122  ;;  %v1256_v56 = vadd.f32 %v2476_v57, %v1120_v39 }
 0x1f7   : > { %v1257_v0 = vadd.f32 %v2476_v57, %v1123_v38 }
 0x1f8   : > { %1336 = vxpose.xlu1.b32.cont [13/16] (narrow) %v1256_v56, 8 }
 0x1f9   : > { %1362 = vxpose.xlu0.b32.cont [7/16] (narrow) %v1266_v62, 8  ;;  %v1216_v61 = vpop.xlane.xlu0 %1215 }
 0x1fa   : > { %v1219_v51 = vpop.xlane.xlu1 %1218  ;;  %v1288_v24 = vadd.f32 %v2476_v57, %v1216_v61 }
 0x1fb   : > { %v1289_v29 = vadd.f32 %v2476_v57, %v1219_v51 }
 0x1fc   : > { %1337 = vxpose.xlu1.b32.cont [14/16] (narrow) %v1257_v0, 8 }
 0x1fd   : > { %1363 = vxpose.xlu0.b32.cont [8/16] (narrow) %v1267_v16, 8  ;;  %v1126_v50 = vpop.xlane.xlu0 %1125 }
 0x1fe   : > { %v1258_v21 = vadd.f32 %v2476_v57, %v1126_v50  ;;  %v1129_v42 = vpop.xlane.xlu1 %1128 }
 0x1ff   : > { %v1259_v47 = vadd.f32 %v2476_v57, %v1129_v42 }
 0x200   : > { %1338 = vxpose.xlu1.b32.cont [15/16] (narrow) %v1258_v21, 8 }
 0x201   : > { %1364 = vxpose.xlu0.b32.cont [9/16] (narrow) %v1268_v36, 8  ;;  %v1222_v28 = vpop.xlane.xlu0 %1221 }
 0x202   : > { %v1290_v31 = vadd.f32 %v2476_v57, %v1222_v28  ;;  %v1225_v33 = vpop.xlane.xlu1 %1224 }
 0x203   : > { %v1291_v35 = vadd.f32 %v2476_v57, %v1225_v33 }
 0x204   : > { %1339 = vxpose.xlu1.b32.end [16/16] (narrow) %v1259_v47, 8 }
 0x205   : > { %1365 = vxpose.xlu0.b32.cont [10/16] (narrow) %v1269_v19, 8 }
 0x208   : > { %1388 = vxpose.xlu1.b32.start [1/16] (narrow) %v1276_v60, 8 }
 0x209   : > { %1366 = vxpose.xlu0.b32.cont [11/16] (narrow) %v1270_v45, 8 }
 0x20c   : > { %1389 = vxpose.xlu1.b32.cont [2/16] (narrow) %v1277_v8, 8 }
 0x20d   : > { %1367 = vxpose.xlu0.b32.cont [12/16] (narrow) %v1271_v2, 8 }
 0x210   : > { %1390 = vxpose.xlu1.b32.cont [3/16] (narrow) %v1278_v43, 8 }
 0x211   : > { %1368 = vxpose.xlu0.b32.cont [13/16] (narrow) %v1272_v9, 8 }
 0x214   : > { %1391 = vxpose.xlu1.b32.cont [4/16] (narrow) %v1279_v14, 8 }
 0x215   : > { %1369 = vxpose.xlu0.b32.cont [14/16] (narrow) %v1273_v5, 8 }
 0x218   : > { %1392 = vxpose.xlu1.b32.cont [5/16] (narrow) %v1280_v54, 8 }
 0x219   : > { %1370 = vxpose.xlu0.b32.cont [15/16] (narrow) %v1274_v18, 8 }
 0x21c   : > { %1393 = vxpose.xlu1.b32.cont [6/16] (narrow) %v1281_v25, 8 }
 0x21d   : > { %1371 = vxpose.xlu0.b32.end [16/16] (narrow) %v1275_v23, 8 }
 0x220   : > { %1394 = vxpose.xlu1.b32.cont [7/16] (narrow) %v1282_v20, 8 }
 0x221   : > { %v1308_v49 = vpop.trf.xlu0 }
 0x224   : > { %1395 = vxpose.xlu1.b32.cont [8/16] (narrow) %v1283_v7, 8 }
 0x228   : > { %1396 = vxpose.xlu1.b32.cont [9/16] (narrow) %v1284_v41, 8 }
 0x22c   : > { %1397 = vxpose.xlu1.b32.cont [10/16] (narrow) %v1285_v30, 8 }
 0x230   : > { %1398 = vxpose.xlu1.b32.cont [11/16] (narrow) %v1286_v37, 8 }
 0x234   : > { %1399 = vxpose.xlu1.b32.cont [12/16] (narrow) %v1287_v22, 8 }
 0x238   : > { %1400 = vxpose.xlu1.b32.cont [13/16] (narrow) %v1288_v24, 8 }
 0x23c   : > { %1401 = vxpose.xlu1.b32.cont [14/16] (narrow) %v1289_v29, 8 }
 0x240   : > { %1402 = vxpose.xlu1.b32.cont [15/16] (narrow) %v1290_v31, 8 }
 0x244   : > { %1403 = vxpose.xlu1.b32.end [16/16] (narrow) %v1291_v35, 8 }
 0x248   : > { %v1340_v52 = vpop.trf.xlu1 }
 0x249   : > { %v1424_v3 = vcombine.low %v1308_v49, %v1340_v52 }
 0x24b   : > { %v1432_v40 = vrot.slane %v1424_v3, %v1431_v63 }
 0x261   : > { %v1372_v53 = vpop.trf.xlu0 }
 0x288   : > { %v1404_v4 = vpop.trf.xlu1 }
 0x289   : > { %v1425_v10 = vcombine.low %v1372_v53, %v1404_v4 }
 0x28b   : > { %v1439_v11 = vrot.slane %v1425_v10, %v1431_v63 }
 0x28d   : > { %v1440_v57 = vcombine.low %v1432_v40, %v1439_v11 }
 0x28f   : > { %v1447_v12 = vrot.slane %v1440_v57, %v1431_v63 }
 0x291   : > { %1453 = vst.msk [vmem:[%s231_s9] sm:$0xf] %vm1451_vm1, %v1447_v12 }
 0x292   : > { %1844 = shalt.err (!%p1841_p3)
}
 0x293   : > { %s1845_s12 = scalar_lea.hbm %s2616_s14, 64  ;;  %s1849_s26 = scalar_lea.hbm %s2663_s5, 128 }
 0x294   : > { %p1846_p4 = scmp.ne.s32.totalorder %s2616_s14, %s1845_s12  ;;  %p1850_p9 = scmp.lt.u32.totalorder %s2616_s14, %s2663_s5 }
 0x295   : > { %p1851_p10 = scmp.lt.u32.totalorder %s1849_s26, %s1845_s12  ;;  %p1853_p12 = scmp.lt.u32.totalorder %s1845_s12, %s2616_s14 }
 0x296   : > { %p1847_p7 = pnand %p1846_p4, %p1965_p5 }
 0x297   : > { %p1852_p11 = por %p1851_p10, %p1850_p9 }
 0x298   : > { %p1848_p8 = pneg %p1847_p7 }
 0x299   : > { %p1854_p13 = por %p1853_p12, %p1852_p11 }
 0x29b   : > { %p1855_p0 = pnand %p1854_p13, %p1848_p8 }
 0x29d   : > { %1858 = shalt.err (!%p1855_p0)
}
 0x29e   : > { %1791 = dma.vmem_to_hbm [thread:$0]  (%p1965_p5), %s2618_s10, 64, %s2616_s14, %s1455_s15  }
 0x29f PF: > { %p1797_p1 = scmp.ge.s32.totalorder %s1893_s23, 2  ;;  %s1481_s7 = sand.u32 1, %s1881_s20  }
 0x2a0   : > { %s1482_s8 = scalar_lea.sflag [#allocation4], %s1481_s7 }
 0x2a1   : > { %p1794_p2 = pnand %p1797_p1, %p1969_p6 }
 0x2a3   : > { %1876 = dma.done.wait (!%p1794_p2), %s1482_s8, 64  }
 0x2a4   : > { %1878 = vsyncadd (!%p1794_p2), %s1482_s8, 4294967232  ;;  %p16_p3 = scmp.ge.s32.totalorder %s1953_s25, 4   ;;  %s2666_s20 = smov %s1885_s21 }
 0x2a5   : > { %s2667_s21 = smov %s1889_s22  ;;  %s2668_s22 = smov %s1963_s28 }
 0x2a6   : > { %s2669_s23 = smov %s1953_s25  ;;  %18 = sbr.rel (!%p16_p3) target bundleno = 5 (0x5), region = 75 }
 0x2ad   :  { %1487 = vsyncpa [#allocation4], 1 }
 0x2ae   :  { %1489 = vsyncpa [#allocation4 + $0x1], 1 }

</bundles_post_ra>
